<compile_context>
chip_gen: v7x
topology: tpu7x:2x2x1
jax: 0.10.0
libtpu: 0.0.40
codegen_flags: <defaults>
</compile_context>

<pallas_src>
import functools
import math

import jax
import jax.numpy as jnp
from jax.experimental import pallas as pl
from jax.experimental.pallas import tpu as pltpu

BASE_REAL_TYPE = jnp.float32   # real-dtype branch of the original module
_LANE = 128
_SUBLANE = 8


def _round_up(x, m):
    return ((x + m - 1) // m) * m


# ----------------------------------------------------------------------------
# Generation-aware hardware budget
# ----------------------------------------------------------------------------
def _tpu_budget():
    """Returns (per-TensorCore VMEM budget bytes, chip likely has 2 TCs)."""
    kind = ""
    try:
        kind = jax.devices()[0].device_kind.lower()
    except Exception:
        pass
    cap = None
    try:
        cap = int(getattr(pltpu.get_tpu_info(), "vmem_capacity_bytes"))
    except Exception:
        cap = None
    if cap is None:
        # v7x: 64 MiB per TensorCore; v4/v5e/v5p/v6e: 128 MiB.
        cap = (64 << 20) if "v7" in kind else (128 << 20)
    # Headroom for Mosaic internal scratch / double-buffer bookkeeping:
    #   128 MiB physical -> ~112 MiB budget, 64 MiB -> ~52 MiB budget.
    budget = cap - max(12 << 20, cap >> 3)
    # Chips with 2 TensorCores per chip (grid axes marked "parallel" shard
    # across them, and resident weights are replicated into EACH TC's VMEM).
    two_tc = any(g in kind for g in ("v7", "v4", "v5p"))
    return budget, two_tc


# ----------------------------------------------------------------------------
# Batch-tile selection
# ----------------------------------------------------------------------------
def _balanced_half(B):
    """Near-equal 2-way split of B rows (sublane aligned; lane aligned only if
    the extra padding keeps the two blocks balanced)."""
    half8 = _round_up(max(pl.cdiv(B, 2), _SUBLANE), _SUBLANE)
    half128 = _round_up(half8, _LANE)
    if 2 * half128 - B <= max(B // 8, _SUBLANE):   # <=~12.5% imbalance
        return half128
    return half8


def _pick_block_b(B, block_b, two_tc):
    B8 = _round_up(B, _SUBLANE)
    if B8 <= block_b:
        if two_tc and B >= 2 * _LANE:
            return _balanced_half(B)       # grid=(2,): one block per TensorCore
        return max(B8, _SUBLANE)
    if two_tc and B8 < 4 * block_b:
        return _balanced_half(B)           # two near-equal blocks (load balance)
    return block_b


# ----------------------------------------------------------------------------
# Parameter setup (deterministic, mimics nn.Linear's U(-1/sqrt(in), 1/sqrt(in)))
# ----------------------------------------------------------------------------
def init_mlp_params(key, in_num, out_num, depth, width, dtype=BASE_REAL_TYPE):
    virt_in = in_num if in_num > 0 else 1          # "virt_in_num" behaviour
    in_nums = [virt_in] + [width] * depth
    out_nums = [width] * depth + [out_num]
    weights = []
    for l in range(depth + 1):
        key, sub = jax.random.split(key)
        bound = 1.0 / float(in_nums[l]) ** 0.5
        # stored as (in_features, out_features) == PyTorch weight transposed
        w = jax.random.uniform(sub, (in_nums[l], out_nums[l]), dtype=dtype,
                               minval=-bound, maxval=bound)
        weights.append(w)
    return weights


def prepare_mlp_params(weights, *, mxu_dtype=None):
    """One-time (init-time) prep: zero-pad every hidden width and the final
    output dim up to a multiple of 128 lanes -> dense MXU passes and unmasked
    lane-dense output stores.  Padding is exact: extra columns are 0,
    leaky_relu(0) == 0, and the matching extra rows of the next weight are 0.

    Call this ONCE and reuse the result — NOT inside the per-step forward
    (per-call padding re-reads/writes all weight bytes in HBM every call).

    mxu_dtype: optionally store the padded weights in a narrower dtype (e.g.
    jnp.bfloat16) so the matmuls run as native bf16 MXU passes (f32
    accumulation is kept).  Changes numerics vs. the f32 reference -> opt-in.
    """
    out_num = int(weights[-1].shape[-1])
    padded = []
    prev_out_p = int(weights[0].shape[0])          # input features stay unpadded
    for w in weights:
        in_l, out_l = int(w.shape[0]), int(w.shape[1])
        assert in_l <= prev_out_p
        out_p = _round_up(out_l, _LANE)
        dt = mxu_dtype if mxu_dtype is not None else w.dtype
        wp = jnp.zeros((prev_out_p, out_p), dtype=dt)
        wp = wp.at[:in_l, :out_l].set(w.astype(dt))
        padded.append(wp)
        prev_out_p = out_p
    return tuple(padded), out_num


# ----------------------------------------------------------------------------
# Pallas kernel: fused chain of matmuls + leaky_relu (except after last layer)
# ----------------------------------------------------------------------------
def _mlp_kernel(*refs, num_layers, negative_slope):
    # refs = (x_ref, w_0, ..., w_{L-1}, o_ref)
    x_ref = refs[0]
    w_refs = refs[1:1 + num_layers]
    o_ref = refs[1 + num_layers]

    h = x_ref[...]
    for l in range(num_layers):
        w = w_refs[l][...]
        lhs = h if h.dtype == w.dtype else h.astype(w.dtype)
        # f32 accumulation on the MXU regardless of operand dtype.
        h = jnp.dot(lhs, w, preferred_element_type=jnp.float32)
        if l < num_layers - 1:
            # leaky_relu: max(h, a*h) == leaky_relu(h) for 0 <= a < 1 (1 VALU op)
            h = jnp.maximum(h, negative_slope * h)
    o_ref[...] = h.astype(o_ref.dtype)
    # TODO(synk): complex-dtype branch (tanh + complex leaky_relu) and the
    # user-supplied `activations` tuple of the PyTorch module are not fused here.


# ----------------------------------------------------------------------------
# Wrapper around pallas_call
# ----------------------------------------------------------------------------
def mlp_forward(x, padded_weights, out_num, *, block_b=None,
                negative_slope=0.01, return_padded=False):
    """Fused MLP forward.  (padded_weights, out_num) come from
    prepare_mlp_params() — pad once at init, not per call."""
    padded_weights = tuple(padded_weights)
    num_layers = len(padded_weights)
    feat = int(padded_weights[0].shape[0])

    # virt_in_num: a 0-input MLP silently becomes an MLP with a constant 1-input
    if x.shape[-1] == 0:
        assert feat == 1
        x = jnp.ones((*x.shape[:-1], 1), dtype=x.dtype)
    assert x.shape[-1] == feat

    lead_shape = x.shape[:-1]
    B = math.prod(lead_shape) if lead_shape else 1
    x2 = x.reshape(B, feat)

    out_p = int(padded_weights[-1].shape[-1])
    # Match the jnp reference's dtype promotion (x @ w), not just x.dtype.
    out_dtype = jnp.result_type(x.dtype, *(w.dtype for w in padded_weights))
    out_itemsize = jnp.dtype(out_dtype).itemsize

    budget, two_tc = _tpu_budget()
    if block_b is None:
        block_b = 512 if budget >= (96 << 20) else 256   # v5e/v6e vs v7x default
    bb = _pick_block_b(B, block_b, two_tc)

    # ---- itemized per-TensorCore VMEM estimate -------------------------------
    weight_bytes = sum(int(w.size) * w.dtype.itemsize for w in padded_weights)
    max_w = max(feat, max(int(w.shape[1]) for w in padded_weights))
    mosaic_scratch = 2 << 20

    def _needed(bb_):
        io = 2 * bb_ * feat * x2.dtype.itemsize           # double-buffered x tiles
        io += 2 * bb_ * out_p * out_itemsize              # double-buffered out tiles
        # ~3 live copies of the widest (bb, width) intermediate: f32 h, its
        # MXU-dtype cast, and the next layer's f32 result.
        inter = 3 * bb_ * max_w * 4
        return weight_bytes + io + inter + mosaic_scratch

    if _needed(_SUBLANE) > budget:
        # TODO(synk): stream weight K/N tiles from HBM (memory_space=pl.ANY +
        # double-buffered pltpu.make_async_copy / pltpu.emit_pipeline, f32
        # accumulator in VMEM scratch) instead of full residency; required once
        # padded weights exceed the per-TensorCore budget (~52 MiB on v7x).
        raise NotImplementedError(
            f"padded weights ({weight_bytes / 2**20:.1f} MiB) exceed the per-core "
            f"VMEM budget ({budget / 2**20:.1f} MiB); weight-streaming fallback "
            f"is not implemented yet")
    while _needed(bb) > budget and bb > _SUBLANE:
        bb = max(_SUBLANE, _round_up(bb // 2, _SUBLANE))

    # Ragged tail block is handled by Pallas: the out-of-range rows carry
    # garbage through the matmuls, but rows are independent and their output
    # writes are discarded, so results are exact.
    grid = (pl.cdiv(B, bb),)

    vmem_limit = int(min(budget, max(32 << 20, _needed(bb) + (4 << 20))))

    flops = 2 * B * sum(int(w.shape[0]) * int(w.shape[1]) for w in padded_weights)
    bytes_accessed = (weight_bytes + B * feat * x2.dtype.itemsize
                      + B * out_p * out_itemsize)

    kernel = functools.partial(_mlp_kernel, num_layers=num_layers,
                               negative_slope=negative_slope)

    in_specs = [pl.BlockSpec((bb, feat), lambda i: (i, 0))]
    # Whole weights resident in VMEM, single-buffered (constant across the grid).
    in_specs += [pl.BlockSpec(memory_space=pltpu.MemorySpace.VMEM)
                 for _ in padded_weights]
    out_spec = pl.BlockSpec((bb, out_p), lambda i: (i, 0))    # lane-dense stores

    out = pl.pallas_call(
        kernel,
        out_shape=jax.ShapeDtypeStruct((B, out_p), out_dtype),
        grid=grid,
        in_specs=in_specs,
        out_specs=out_spec,
        compiler_params=pltpu.CompilerParams(
            dimension_semantics=("parallel",),
            vmem_limit_bytes=vmem_limit),
        cost_estimate=pl.CostEstimate(flops=flops, transcendentals=0,
                                      bytes_accessed=bytes_accessed),
    )(x2, *padded_weights)

    if return_padded:
        # Callers that can consume the lane-padded (.., out_p) output directly
        # skip an HBM->HBM slice copy (useful when out_num << 128 and B large).
        return out.reshape(*lead_shape, out_p)
    if out_num != out_p:
        out = out[:, :out_num]
    return out.reshape(*lead_shape, out_num)


# ----------------------------------------------------------------------------
# Pure-JAX reference (mirrors the PyTorch forward, real-dtype branch)
# ----------------------------------------------------------------------------
def mlp_reference(x, weights, negative_slope=0.01):
    if x.shape[-1] == 0:
        x = jnp.ones((*x.shape[:-1], 1), dtype=x.dtype)
    h = x
    for l in range(len(weights)):
        h = h @ weights[l]
        if l < len(weights) - 1:
            h = jnp.where(h > 0, h, negative_slope * h)
    return h


if __name__ == "__main__":
    # small MLP: in_num=16, depth=2 hidden layers of width=32, out_num=8
    in_num, out_num, depth, width = 16, 8, 2, 32

    key = jax.random.PRNGKey(0)
    key, kx = jax.random.split(key)
    weights = init_mlp_params(key, in_num, out_num, depth, width)
    padded, out_n = prepare_mlp_params(weights)      # pad ONCE, outside hot path

    # input with generic leading dims, features last (same as PyTorch module)
    x = jax.random.normal(kx, (2, 8, in_num), dtype=BASE_REAL_TYPE)

    y = jax.block_until_ready(mlp_forward(x, padded, out_n))
    y_ref = mlp_reference(x, weights)
    assert y.shape == (2, 8, out_num)
    assert y.dtype == y_ref.dtype
    assert jnp.allclose(y, y_ref, atol=1e-5, rtol=1e-5)

    # virt_in_num path: in_num == 0 -> silently a constant input of size 1
    key, k0 = jax.random.split(key)
    weights0 = init_mlp_params(k0, 0, out_num, 1, width)
    padded0, out_n0 = prepare_mlp_params(weights0)
    x0 = jnp.zeros((4, 0), dtype=BASE_REAL_TYPE)
    y0 = jax.block_until_ready(mlp_forward(x0, padded0, out_n0))
    y0_ref = mlp_reference(x0, weights0)
    assert y0.shape == (4, out_num)
    assert jnp.allclose(y0, y0_ref, atol=1e-5, rtol=1e-5)

    # opt-in bf16 MXU passes (f32 accumulation kept); looser tolerance vs f32 ref
    padded_bf16, _ = prepare_mlp_params(weights, mxu_dtype=jnp.bfloat16)
    yb = jax.block_until_ready(mlp_forward(x, padded_bf16, out_n))
    assert yb.dtype == y_ref.dtype            # result_type(f32, bf16) == f32
    assert jnp.allclose(yb, y_ref, atol=5e-2, rtol=5e-2)

    print("KERNEL_OK")
</pallas_src>

<mosaic_0001>
module attributes {stable_mosaic.version = 11 : i64} {
  func.func @_mlp_kernel(%arg0: i32, %arg1: memref<16x16xf32, #tpu.memory_space<vmem>>, %arg2: memref<16x128xf32, #tpu.memory_space<vmem>>, %arg3: memref<128x128xf32, #tpu.memory_space<vmem>>, %arg4: memref<128x128xf32, #tpu.memory_space<vmem>>, %arg5: memref<16x128xf32, #tpu.memory_space<vmem>>) attributes {dimension_semantics = [#tpu.dimension_semantics<parallel>], iteration_bounds = array<i64: 1>, scalar_prefetch = 0 : i64, scratch_operands = 0 : i64, tpu.core_type = #tpu.core_type<tc>, window_params = [{transform_indices = @transform_0, window_bounds = array<i64: 16, 16>}, {pipeline_mode = #tpu.pipeline_mode<synchronous>, transform_indices = @transform_1, window_bounds = array<i64: 16, 128>}, {pipeline_mode = #tpu.pipeline_mode<synchronous>, transform_indices = @transform_2, window_bounds = array<i64: 128, 128>}, {pipeline_mode = #tpu.pipeline_mode<synchronous>, transform_indices = @transform_3, window_bounds = array<i64: 128, 128>}, {transform_indices = @transform_4, window_bounds = array<i64: 16, 128>}]} {
    %c0 = arith.constant 0 : index
    %c0_0 = arith.constant 0 : index
    %0 = vector.load %arg1[%c0, %c0_0] : memref<16x16xf32, #tpu.memory_space<vmem>>, vector<16x16xf32>
    %c0_1 = arith.constant 0 : index
    %c0_2 = arith.constant 0 : index
    %1 = vector.load %arg2[%c0_1, %c0_2] : memref<16x128xf32, #tpu.memory_space<vmem>>, vector<16x128xf32>
    %cst = arith.constant dense<0.000000e+00> : vector<16x128xf32>
    %2 = tpu.matmul %0, %1, %cst {dimension_numbers = #tpu.dot_dimension_numbers<[1], [0], [0], [1], [0, 0, 1, 1], [], []>} : vector<16x16xf32>, vector<16x128xf32>, vector<16x128xf32> -> vector<16x128xf32>
    %cst_3 = arith.constant 0.00999999977 : f32
    %3 = vector.broadcast %cst_3 : f32 to vector<16x128xf32>
    %4 = arith.mulf %3, %2 : vector<16x128xf32>
    %5 = arith.maximumf %2, %4 : vector<16x128xf32>
    %c0_4 = arith.constant 0 : index
    %c0_5 = arith.constant 0 : index
    %6 = vector.load %arg3[%c0_4, %c0_5] : memref<128x128xf32, #tpu.memory_space<vmem>>, vector<128x128xf32>
    %cst_6 = arith.constant dense<0.000000e+00> : vector<16x128xf32>
    %7 = tpu.matmul %5, %6, %cst_6 {dimension_numbers = #tpu.dot_dimension_numbers<[1], [0], [0], [1], [0, 0, 1, 1], [], []>} : vector<16x128xf32>, vector<128x128xf32>, vector<16x128xf32> -> vector<16x128xf32>
    %cst_7 = arith.constant 0.00999999977 : f32
    %8 = vector.broadcast %cst_7 : f32 to vector<16x128xf32>
    %9 = arith.mulf %8, %7 : vector<16x128xf32>
    %10 = arith.maximumf %7, %9 : vector<16x128xf32>
    %c0_8 = arith.constant 0 : index
    %c0_9 = arith.constant 0 : index
    %11 = vector.load %arg4[%c0_8, %c0_9] : memref<128x128xf32, #tpu.memory_space<vmem>>, vector<128x128xf32>
    %cst_10 = arith.constant dense<0.000000e+00> : vector<16x128xf32>
    %12 = tpu.matmul %10, %11, %cst_10 {dimension_numbers = #tpu.dot_dimension_numbers<[1], [0], [0], [1], [0, 0, 1, 1], [], []>} : vector<16x128xf32>, vector<128x128xf32>, vector<16x128xf32> -> vector<16x128xf32>
    %c0_11 = arith.constant 0 : index
    %c0_12 = arith.constant 0 : index
    %13 = vector.load %arg5[%c0_11, %c0_12] : memref<16x128xf32, #tpu.memory_space<vmem>>, vector<16x128xf32>
    tpu.vector_store %arg5[%c0_11, %c0_12], %12 {strides = array<i32>} : memref<16x128xf32, #tpu.memory_space<vmem>>, vector<16x128xf32>,
    return
  }
  func.func @transform_0(%arg0: i32) -> (i32, i32) {
    %c0_i32 = arith.constant 0 : i32
    %c0_i32_0 = arith.constant 0 : i32
    return %arg0, %c0_i32 : i32, i32
  }
  func.func @transform_1(%arg0: i32) -> (i32, i32) {
    %c0_i32 = arith.constant 0 : i32
    %c0_i32_0 = arith.constant 0 : i32
    %c0_i32_1 = arith.constant 0 : i32
    return %c0_i32, %c0_i32_0 : i32, i32
  }
  func.func @transform_2(%arg0: i32) -> (i32, i32) {
    %c0_i32 = arith.constant 0 : i32
    %c0_i32_0 = arith.constant 0 : i32
    %c0_i32_1 = arith.constant 0 : i32
    return %c0_i32, %c0_i32_0 : i32, i32
  }
  func.func @transform_3(%arg0: i32) -> (i32, i32) {
    %c0_i32 = arith.constant 0 : i32
    %c0_i32_0 = arith.constant 0 : i32
    %c0_i32_1 = arith.constant 0 : i32
    return %c0_i32, %c0_i32_0 : i32, i32
  }
  func.func @transform_4(%arg0: i32) -> (i32, i32) {
    %c0_i32 = arith.constant 0 : i32
    %c0_i32_0 = arith.constant 0 : i32
    return %arg0, %c0_i32 : i32, i32
  }
}

</mosaic_0001>

<bundles_post_ra>
// kernel: tpu_custom_call.1
= control target key start
LH: loop header
LB: loop body
LE: loop exit
PB: predicated region body
PF: predicated region fallthrough
CT: control target
= control target key end

     0   :  { %9 = vsyncpa [#allocation3], 0  ;;  %s805_s0 = inlined_call_operand.hbm [shape: f32[16,16], index: 0, kind: input, shape index: {}]   ;;  %s806_s1 = inlined_call_operand.hbm [shape: f32[16,128], index: 1, kind: input, shape index: {}]   ;;  %s807_s2 = inlined_call_operand.hbm [shape: f32[128,128], index: 2, kind: input, shape index: {}]   ;;  %s808_s3 = inlined_call_operand.hbm [shape: f32[128,128], index: 3, kind: input, shape index: {}]   ;;  %s809_s4 = inlined_call_operand.hbm [shape: f32[16,128], index: 4, kind: output, shape index: {}]  }
   0x1   :  { %10 = vsyncpa [#allocation6], 0 }
   0x2   :  { %11 = vsyncpa [#allocation9], 0 }
   0x3   :  { %12 = vsyncpa [#allocation4], 0  ;;  %s682_s15 = smov [#allocation5]   ;;  %s683_s17 = smov [#allocation2]  }
   0x4   :  { %s30_s16 = sshll.u32 %s682_s15, 4  ;;  %s18_s18 = sshll.u32 %s683_s17, 4  ;;  %s31_s16 = int_to_ptr.vmem [resolvable:$true] %s30_s16  ;;  %s714_s18 = int_to_ptr.vmem [resolvable:$true] %s18_s18 }
   0x5   :  { %s564_s21 = scalar_lea.hbm %s806_s1, 256 }
   0x6   :  { %p565_p0 = scmp.ne.s32.totalorder %s806_s1, %s564_s21  ;;  %p568_p1 = scmp.lt.u32.totalorder %s564_s21, %s806_s1 }
   0x8   :  { %p570_p2 = pnand %p568_p1, %p565_p0 }
   0xa   :  { %573 = shalt.err (!%p570_p2)
}
   0xb   :  { %s574_s26 = scalar_lea.vmem %s31_s16, 256  ;;  %p579_p4 = scmp.lt.s32.totalorder %s31_s16, %s31_s16 }
   0xc   :  { %p575_p3 = scmp.ne.s32.totalorder %s31_s16, %s574_s26  ;;  %p580_p5 = scmp.lt.s32.totalorder %s574_s26, %s574_s26 }
   0xe   :  { %p581_p6 = por %p580_p5, %p579_p4 }
  0x10   :  { %p582_p7 = pnand %p581_p6, %p575_p3 }
  0x12   :  { %585 = shalt.err (!%p582_p7)
}
  0x13   :  { %s684_s27 = smov 128   ;;  %s685_s28 = smov 8  }
  0x14   :  { %36 = dma.hbm_to_vmem [thread:$0]  %s806_s1, 256, %s31_s16, [#allocation6], %s684_s27, %s684_s27, %s685_s28  }
  0x15   :  { %s586_s7 = scalar_lea.hbm %s805_s0, 256 }
  0x16   :  { %p587_p8 = scmp.ne.s32.totalorder %s805_s0, %s586_s7  ;;  %p590_p9 = scmp.lt.u32.totalorder %s586_s7, %s805_s0 }
  0x18   :  { %p592_p10 = pnand %p590_p9, %p587_p8 }
  0x1a   :  { %595 = shalt.err (!%p592_p10)
}
  0x1b   :  { %s596_s12 = scalar_lea.vmem %s714_s18, 256  ;;  %p601_p12 = scmp.lt.s32.totalorder %s714_s18, %s714_s18 }
  0x1c   :  { %p597_p11 = scmp.ne.s32.totalorder %s714_s18, %s596_s12  ;;  %p602_p13 = scmp.lt.s32.totalorder %s596_s12, %s596_s12 }
  0x1e   :  { %p603_p0 = por %p602_p13, %p601_p12 }
  0x20   :  { %p604_p1 = pnand %p603_p0, %p597_p11 }
  0x22   :  { %607 = shalt.err (!%p604_p1)
}
  0x23   :  { %24 = dma.hbm_to_vmem [thread:$0]  %s805_s0, 256, %s714_s18, [#allocation3], %s684_s27, %s684_s27, %s685_s28  }
  0x24   :  { %s686_s14 = smov [#allocation7]   ;;  %s687_s16 = smov [#allocation8]  }
  0x25   :  { %s42_s15 = sshll.u32 %s686_s14, 4  ;;  %s54_s17 = sshll.u32 %s687_s16, 4  ;;  %s43_s15 = int_to_ptr.vmem [resolvable:$true] %s42_s15  ;;  %s751_s17 = int_to_ptr.vmem [resolvable:$true] %s54_s17 }
  0x26   :  { %s608_s21 = scalar_lea.hbm %s807_s2, 2048 }
  0x27   :  { %p609_p2 = scmp.ne.s32.totalorder %s807_s2, %s608_s21  ;;  %p612_p3 = scmp.lt.u32.totalorder %s608_s21, %s807_s2 }
  0x29   :  { %p614_p4 = pnand %p612_p3, %p609_p2 }
  0x2b   :  { %617 = shalt.err (!%p614_p4)
}
  0x2c   :  { %s618_s0 = scalar_lea.vmem %s43_s15, 2048  ;;  %p623_p6 = scmp.lt.s32.totalorder %s43_s15, %s43_s15 }
  0x2d   :  { %p619_p5 = scmp.ne.s32.totalorder %s43_s15, %s618_s0  ;;  %p624_p7 = scmp.lt.s32.totalorder %s618_s0, %s618_s0 }
  0x2f   :  { %p625_p8 = por %p624_p7, %p623_p6 }
  0x31   :  { %p626_p9 = pnand %p625_p8, %p619_p5 }
  0x33   :  { %629 = shalt.err (!%p626_p9)
}
  0x34   :  { %48 = dma.hbm_to_vmem [thread:$0]  %s807_s2, 2048, %s43_s15, [#allocation6], %s684_s27, %s684_s27, %s685_s28  }
  0x35   :  { %s630_s5 = scalar_lea.hbm %s808_s3, 2048 }
  0x36   :  { %p631_p10 = scmp.ne.s32.totalorder %s808_s3, %s630_s5  ;;  %p634_p11 = scmp.lt.u32.totalorder %s630_s5, %s808_s3 }
  0x38   :  { %p636_p12 = pnand %p634_p11, %p631_p10 }
  0x3a   :  { %639 = shalt.err (!%p636_p12)
}
  0x3b   :  { %s640_s10 = scalar_lea.vmem %s751_s17, 2048  ;;  %p645_p0 = scmp.lt.s32.totalorder %s751_s17, %s751_s17 }
  0x3c   :  { %p641_p13 = scmp.ne.s32.totalorder %s751_s17, %s640_s10  ;;  %p646_p1 = scmp.lt.s32.totalorder %s640_s10, %s640_s10 }
  0x3e   :  { %p647_p2 = por %p646_p1, %p645_p0 }
  0x40   :  { %p648_p3 = pnand %p647_p2, %p641_p13 }
  0x42   :  { %651 = shalt.err (!%p648_p3)
}
  0x43   :  { %60 = dma.hbm_to_vmem [thread:$0]  %s808_s3, 2048, %s751_s17, [#allocation9], %s684_s27, %s684_s27, %s685_s28  }
  0x44   :  { %674 = dma.done.wait [#allocation3], 256  }
  0x45   :  { %675 = vsyncadd [#allocation3], 4294967040 }
  0x46   :  { %676 = dma.done.wait [#allocation6], 2304  }
  0x47   :  { %677 = vsyncadd [#allocation6], 4294964992 }
  0x48   :  { %678 = dma.done.wait [#allocation9], 2048  }
  0x49   :  { %679 = vsyncadd [#allocation9], 4294965248  ;;  %vm77_vm0 = vcmask 130048   ;;  %v75_v0 = vld [vmem:[#allocation5] sm:$0xff]  ;;  %v76_v1 = vld [vmem:[#allocation5 + $0x8] sm:$0xff]  ;;  %s688_s3 = smov [#allocation10]  }
  0x4a   :  { %v73_v2 = vld [vmem:[#allocation2] sm:$0xff]  ;;  %v489_v3 = vpack.c.bf16 %v76_v1, %v75_v0  ;;  %v164_v5 = vld [vmem:[#allocation7 + $0x8] sm:$0xff]  ;;  %v165_v7 = vld [vmem:[#allocation7 + $0x10] sm:$0xff]  ;;  %s356_s12 = sshll.u32 %s688_s3, 4  ;;  %s357_s12 = int_to_ptr.vmem [resolvable:$true] %s356_s12 }
  0x4b   :  { %416 = vmatprep.mubr.msk.f32.mxu0 %vm77_vm0, %v73_v2  ;;  %v163_v4 = vld [vmem:[#allocation7] sm:$0xff]  ;;  %v166_v8 = vld [vmem:[#allocation7 + $0x18] sm:$0xff]  ;;  %v168_v11 = vld [vmem:[#allocation7 + $0x28] sm:$0xff]  ;;  %s652_s1 = scalar_lea.vmem %s357_s12, 256  ;;  %p657_p5 = scmp.lt.s32.totalorder %s357_s12, %s357_s12 }
  0x4c   :  { %v493_v6 = vpack.c.bf16 %v164_v5, %v163_v4  ;;  %490 = vmatprep.subr.bf16.mxu0 %v489_v3  ;;  %v497_v9 = vpack.c.bf16 %v166_v8, %v165_v7  ;;  %v167_v10 = vld [vmem:[#allocation7 + $0x20] sm:$0xff]  ;;  %v74_v12 = vld [vmem:[#allocation2 + $0x8] sm:$0xff]  ;;  %v169_v14 = vld [vmem:[#allocation7 + $0x30] sm:$0xff]  ;;  %p653_p4 = scmp.ne.s32.totalorder %s357_s12, %s652_s1  ;;  %p658_p6 = scmp.lt.s32.totalorder %s652_s1, %s652_s1 }
  0x4d   :  { %492 = vmatpush3.bf16.msra.mxu0 %v489_v3  ;;  %v501_v13 = vpack.c.bf16 %v168_v11, %v167_v10  ;;  %v170_v15 = vld [vmem:[#allocation7 + $0x38] sm:$0xff]  ;;  %v171_v17 = vld [vmem:[#allocation7 + $0x40] sm:$0xff]  ;;  %v172_v18 = vld [vmem:[#allocation7 + $0x48] sm:$0xff] }
  0x4e   :  { %494 = vmatprep.subr.bf16.mxu1 %v493_v6  ;;  %v505_v16 = vpack.c.bf16 %v170_v15, %v169_v14  ;;  %v509_v19 = vpack.c.bf16 %v172_v18, %v171_v17  ;;  %v173_v20 = vld [vmem:[#allocation7 + $0x50] sm:$0xff]  ;;  %v174_v21 = vld [vmem:[#allocation7 + $0x58] sm:$0xff]  ;;  %v175_v23 = vld [vmem:[#allocation7 + $0x60] sm:$0xff]  ;;  %p659_p7 = por %p658_p6, %p657_p5 }
  0x4f   :  { %496 = vmatpush3.bf16.msra.mxu1 %v493_v6  ;;  %v513_v22 = vpack.c.bf16 %v174_v21, %v173_v20  ;;  %v176_v24 = vld [vmem:[#allocation7 + $0x68] sm:$0xff]  ;;  %v177_v26 = vld [vmem:[#allocation7 + $0x70] sm:$0xff]  ;;  %v178_v27 = vld [vmem:[#allocation7 + $0x78] sm:$0xff] }
  0x50   :  { %498 = vmatprep.subr.bf16.mxu1 %v497_v9  ;;  %417 = vmatmul.mubr.msk.f32.vlgmr.msra.gmra.mrb[0].mxu0 %vm77_vm0, %v74_v12  ;;  %v517_v25 = vpack.c.bf16 %v176_v24, %v175_v23  ;;  %v521_v28 = vpack.c.bf16 %v178_v27, %v177_v26  ;;  %v258_v29 = vld [vmem:[#allocation8] sm:$0xff]  ;;  %v259_v30 = vld [vmem:[#allocation8 + $0x8] sm:$0xff]  ;;  %v260_v31 = vld [vmem:[#allocation8 + $0x10] sm:$0xff]  ;;  %p660_p8 = pnand %p659_p7, %p653_p4 }
  0x51   :  { %v525_v32 = vpack.c.bf16 %v259_v30, %v258_v29  ;;  %v261_v33 = vld [vmem:[#allocation8 + $0x18] sm:$0xff]  ;;  %v262_v35 = vld [vmem:[#allocation8 + $0x20] sm:$0xff]  ;;  %v263_v36 = vld [vmem:[#allocation8 + $0x28] sm:$0xff] }
  0x52   :  { %v529_v34 = vpack.c.bf16 %v261_v33, %v260_v31  ;;  %v533_v37 = vpack.c.bf16 %v263_v36, %v262_v35  ;;  %v264_v38 = vld [vmem:[#allocation8 + $0x30] sm:$0xff]  ;;  %v265_v39 = vld [vmem:[#allocation8 + $0x38] sm:$0xff]  ;;  %v266_v41 = vld [vmem:[#allocation8 + $0x40] sm:$0xff] }
  0x53   :  { %500 = vmatpush3.bf16.msra.mxu1 %v497_v9  ;;  %526 = vmatprep.subr.bf16.mxu0 %v525_v32  ;;  %v537_v40 = vpack.c.bf16 %v265_v39, %v264_v38  ;;  %v267_v42 = vld [vmem:[#allocation8 + $0x48] sm:$0xff]  ;;  %v268_v44 = vld [vmem:[#allocation8 + $0x50] sm:$0xff]  ;;  %v269_v45 = vld [vmem:[#allocation8 + $0x58] sm:$0xff] }
  0x54   :  { %502 = vmatprep.subr.bf16.mxu1 %v501_v13  ;;  %528 = vmatpush3.bf16.msra.mxu0 %v525_v32  ;;  %v541_v43 = vpack.c.bf16 %v267_v42, %v266_v41  ;;  %v545_v46 = vpack.c.bf16 %v269_v45, %v268_v44  ;;  %v270_v47 = vld [vmem:[#allocation8 + $0x60] sm:$0xff]  ;;  %v271_v48 = vld [vmem:[#allocation8 + $0x68] sm:$0xff]  ;;  %v272_v56 = vld [vmem:[#allocation8 + $0x70] sm:$0xff] }
  0x55   :  { %530 = vmatprep.subr.bf16.mxu0 %v529_v34  ;;  %v549_v49 = vpack.c.bf16 %v271_v48, %v270_v47  ;;  %v273_v57 = vld [vmem:[#allocation8 + $0x78] sm:$0xff] }
  0x56   :  { %v553_v58 = vpack.c.bf16 %v273_v57, %v272_v56 }
  0x57   :  { %504 = vmatpush3.bf16.msra.mxu1 %v501_v13 }
  0x58   :  { %506 = vmatprep.subr.bf16.mxu1 %v505_v16  ;;  %532 = vmatpush3.bf16.msra.mxu0 %v529_v34 }
  0x59   :  { %534 = vmatprep.subr.bf16.mxu0 %v533_v37 }
  0x5b   :  { %508 = vmatpush3.bf16.msra.mxu1 %v505_v16 }
  0x5c   :  { %510 = vmatprep.subr.bf16.mxu1 %v509_v19  ;;  %536 = vmatpush3.bf16.msra.mxu0 %v533_v37 }
  0x5d   :  { %538 = vmatprep.subr.bf16.mxu0 %v537_v40 }
  0x5f   :  { %512 = vmatpush3.bf16.msra.mxu1 %v509_v19 }
  0x60   :  { %514 = vmatprep.subr.bf16.mxu1 %v513_v22  ;;  %540 = vmatpush3.bf16.msra.mxu0 %v537_v40 }
  0x61   :  { %542 = vmatprep.subr.bf16.mxu0 %v541_v43 }
  0x63   :  { %516 = vmatpush3.bf16.msra.mxu1 %v513_v22 }
  0x64   :  { %518 = vmatprep.subr.bf16.mxu1 %v517_v25  ;;  %544 = vmatpush3.bf16.msra.mxu0 %v541_v43 }
  0x65   :  { %546 = vmatprep.subr.bf16.mxu0 %v545_v46 }
  0x67   :  { %520 = vmatpush3.bf16.msra.mxu1 %v517_v25 }
  0x68   :  { %522 = vmatprep.subr.bf16.mxu1 %v521_v28  ;;  %548 = vmatpush3.bf16.msra.mxu0 %v545_v46 }
  0x69   :  { %550 = vmatprep.subr.bf16.mxu0 %v549_v49 }
  0x6b   :  { %524 = vmatpush3.bf16.msra.mxu1 %v521_v28 }
  0x6c   :  { %552 = vmatpush3.bf16.msra.mxu0 %v549_v49 }
  0x6d   :  { %554 = vmatprep.subr.bf16.mxu0 %v553_v58 }
  0x70   :  { %556 = vmatpush3.bf16.msra.mxu0 %v553_v58 }
 0x123   :  { %v418_v50 = vpop.f32.mrb[0].mxu0 }
 0x124   :  { %v160_v51 = vmul.f32 0.01, %v418_v50  ;;  %v150_v52 = vpop.f32.mrb[1].mxu0 }
 0x125   :  { %v159_v53 = vmul.f32 0.01, %v150_v52 }
 0x126   :  { %v162_v55 = vmax.f32 %v418_v50, %v160_v51 }
 0x127   :  { %v161_v54 = vmax.f32 %v150_v52, %v159_v53 }
 0x129   :  { %451 = vmatprep.mubr.f32.mxu1 %v161_v54 }
 0x12a   :  { %452 = vmatmul.mubr.f32.vlgmr.msra.gmra.mrb[0].mxu1 %v162_v55 }
 0x1fd   :  { %v453_v59 = vpop.f32.mrb[0].mxu1 }
 0x1fe   :  { %v255_v60 = vmul.f32 0.01, %v453_v59  ;;  %v245_v61 = vpop.f32.mrb[1].mxu1 }
 0x1ff   :  { %v254_v62 = vmul.f32 0.01, %v245_v61 }
 0x200   :  { %v257_v0 = vmax.f32 %v453_v59, %v255_v60 }
 0x201   :  { %v256_v63 = vmax.f32 %v245_v61, %v254_v62 }
 0x203   :  { %486 = vmatprep.mubr.f32.mxu0 %v256_v63 }
 0x204   :  { %487 = vmatmul.mubr.f32.vlgmr.msra.gmra.mrb[2].mxu0 %v257_v0 }
 0x2d7   :  { %v488_v1 = vpop.f32.mrb[2].mxu0 }
 0x2d8   :  { %350 = vst [vmem:[#allocation10 + $0x8] sm:$0xff] %v488_v1  ;;  %v340_v2 = vpop.f32.mrb[3].mxu0 }
 0x2d9   :  { %349 = vst [vmem:[#allocation10] sm:$0xff] %v340_v2 }
 0x2da   :  { %663 = shalt.err (!%p660_p8)
}
 0x2db   :  { %s664_s15 = scalar_lea.hbm %s809_s4, 256 }
 0x2dc   :  { %p665_p9 = scmp.ne.s32.totalorder %s809_s4, %s664_s15  ;;  %p668_p10 = scmp.lt.u32.totalorder %s664_s15, %s809_s4 }
 0x2de   :  { %p670_p11 = pnand %p668_p10, %p665_p9 }
 0x2e0   :  { %673 = shalt.err (!%p670_p11)
}
 0x2e1   :  { %362 = dma.vmem_to_hbm [thread:$0]  %s357_s12, 256, %s809_s4, [#allocation4], %s684_s27, %s684_s27, %s685_s28  }
 0x2e2   :  { %680 = dma.done.wait [#allocation4], 256  }
 0x2e3   :  { %681 = vsyncadd [#allocation4], 4294967040 }
 0x2e4   :  { %366 = vsyncpa [#allocation3], 1 }
 0x2e5   :  { %367 = vsyncpa [#allocation6], 1 }
 0x2e6   :  { %368 = vsyncpa [#allocation9], 1 }
 0x2e7   :  { %369 = vsyncpa [#allocation4], 1 }

</bundles_post_ra>
